<compile_context>
chip_gen: v5e
topology: v5e:2x2
jax: 0.10.0
libtpu: 0.0.40
codegen_flags: <defaults>
</compile_context>

<pallas_src>
import functools

import jax
import jax.numpy as jnp
from jax.experimental import pallas as pl
from jax.experimental.pallas import tpu as pltpu


def _outconv_kernel(w_ref, b_ref, x_ref, o_ref):
    # w_ref: (C_out, C_in)   -- resident in VMEM (constant block index)
    # b_ref: (C_out, 1)      -- resident in VMEM
    # x_ref: (C_in, tile)    -- lane-dense spatial tile of one image
    # o_ref: (C_out, tile)   -- lane-dense output tile
    acc = jnp.dot(w_ref[...], x_ref[...], preferred_element_type=jnp.float32)
    o_ref[...] = (acc + b_ref[...]).astype(o_ref.dtype)


@functools.partial(jax.jit, static_argnames=("max_tile",))
def outconv_1x1(x_nchw, weight, bias, *, max_tile=2048):
    """1x1 conv forward.

    x_nchw: (N, C_in, H, W)
    weight: (C_out, C_in)   -- squeezed 1x1 conv weight
    bias:   (C_out,)
    returns (N, C_out, H, W)
    """
    N, C_in, H, W = x_nchw.shape
    C_out = weight.shape[0]
    HW = H * W

    # Spatial tile: multiple of 128 lanes, whole (padded) H*W if small,
    # capped at max_tile to stay tiny in VMEM on every generation.
    tile = min(max_tile, pl.cdiv(HW, 128) * 128)
    HW_pad = pl.cdiv(HW, tile) * tile

    # NCHW -> (N, C_in, H*W) is a free reshape (no data movement).
    x = x_nchw.reshape(N, C_in, HW)
    if HW_pad != HW:
        x = jnp.pad(x, ((0, 0), (0, 0), (0, HW_pad - HW)))

    b = bias.reshape(C_out, 1)  # column broadcast over lanes

    out = pl.pallas_call(
        _outconv_kernel,
        out_shape=jax.ShapeDtypeStruct((N, C_out, HW_pad), x.dtype),
        grid_spec=pltpu.PrefetchScalarGridSpec(
            num_scalar_prefetch=0,
            grid=(N, HW_pad // tile),
            in_specs=[
                # Weight / bias: constant block index -> stays resident, no
                # per-step re-DMA.
                pl.BlockSpec((C_out, C_in), lambda n, j: (0, 0)),
                pl.BlockSpec((C_out, 1), lambda n, j: (0, 0)),
                # Input: batch dim squeezed, channels full, spatial lane tile.
                pl.BlockSpec((None, C_in, tile), lambda n, j: (n, 0, j)),
            ],
            out_specs=pl.BlockSpec((None, C_out, tile), lambda n, j: (n, 0, j)),
        ),
        compiler_params=pltpu.CompilerParams(
            dimension_semantics=("parallel", "parallel"),
        ),
    )(weight, b, x)

    if HW_pad != HW:
        out = out[:, :, :HW]
    return out.reshape(N, C_out, H, W)


if __name__ == "__main__":
    key = jax.random.PRNGKey(0)
    kx, kw, kb = jax.random.split(key, 3)

    N, C_in, C_out, Hs, Ws = 2, 4, 3, 16, 16
    x = jax.random.normal(kx, (N, C_in, Hs, Ws), dtype=jnp.float32)
    # Deterministic synthetic parameters (nn.Conv2d(in, out, 1) weights with
    # the trailing 1x1 kernel dims squeezed away).
    weight = jax.random.normal(kw, (C_out, C_in), dtype=jnp.float32) * 0.1
    bias = jax.random.normal(kb, (C_out,), dtype=jnp.float32) * 0.1

    out = outconv_1x1(x, weight, bias)
    jax.block_until_ready(out)

    # Reference check in plain JAX (NCHW 1x1 conv == einsum over channel axis).
    ref = jnp.einsum("nchw,oc->nohw", x, weight) + bias[None, :, None, None]
    assert out.shape == (N, C_out, Hs, Ws)
    assert jnp.allclose(out, ref, atol=1e-5, rtol=1e-5)

    print("KERNEL_OK")
</pallas_src>

<mosaic_0001>
module attributes {stable_mosaic.version = 11 : i64} {
  func.func @_outconv_kernel(%arg0: i32, %arg1: i32, %arg2: memref<3x4xf32, #tpu.memory_space<vmem>>, %arg3: memref<3x1xf32, #tpu.memory_space<vmem>>, %arg4: memref<1x4x256xf32, #tpu.memory_space<vmem>>, %arg5: memref<1x3x256xf32, #tpu.memory_space<vmem>>) attributes {dimension_semantics = [#tpu.dimension_semantics<parallel>, #tpu.dimension_semantics<parallel>], iteration_bounds = array<i64: 2, 1>, scalar_prefetch = 0 : i64, scratch_operands = 0 : i64, tpu.core_type = #tpu.core_type<tc>, window_params = [{pipeline_mode = #tpu.pipeline_mode<synchronous>, transform_indices = @transform_0, window_bounds = array<i64: 3, 4>}, {pipeline_mode = #tpu.pipeline_mode<synchronous>, transform_indices = @transform_1, window_bounds = array<i64: 3, 1>}, {transform_indices = @transform_2, window_bounds = array<i64: 1, 4, 256>}, {transform_indices = @transform_3, window_bounds = array<i64: 1, 3, 256>}]} {
    %c0 = arith.constant 0 : index
    %c0_0 = arith.constant 0 : index
    %0 = vector.load %arg2[%c0, %c0_0] : memref<3x4xf32, #tpu.memory_space<vmem>>, vector<3x4xf32>
    %c0_1 = arith.constant 0 : index
    %c0_2 = arith.constant 0 : index
    %c0_3 = arith.constant 0 : index
    %1 = vector.load %arg4[%c0_1, %c0_2, %c0_3] : memref<1x4x256xf32, #tpu.memory_space<vmem>>, vector<1x4x256xf32>
    %2 = vector.shape_cast %1 : vector<1x4x256xf32> to vector<4x256xf32>
    %cst = arith.constant dense<0.000000e+00> : vector<3x256xf32>
    %3 = tpu.matmul %0, %2, %cst {dimension_numbers = #tpu.dot_dimension_numbers<[1], [0], [0], [1], [0, 0, 1, 1], [], []>} : vector<3x4xf32>, vector<4x256xf32>, vector<3x256xf32> -> vector<3x256xf32>
    %c0_4 = arith.constant 0 : index
    %c0_5 = arith.constant 0 : index
    %4 = vector.load %arg3[%c0_4, %c0_5] : memref<3x1xf32, #tpu.memory_space<vmem>>, vector<3x1xf32>
    %5 = vector.broadcast %4 : vector<3x1xf32> to vector<3x256xf32>
    %6 = arith.addf %3, %5 : vector<3x256xf32>
    %c0_6 = arith.constant 0 : index
    %c0_7 = arith.constant 0 : index
    %c0_8 = arith.constant 0 : index
    %7 = vector.load %arg5[%c0_6, %c0_7, %c0_8] : memref<1x3x256xf32, #tpu.memory_space<vmem>>, vector<1x3x256xf32>
    %8 = vector.shape_cast %7 : vector<1x3x256xf32> to vector<3x256xf32>
    %9 = vector.shape_cast %6 : vector<3x256xf32> to vector<1x3x256xf32>
    tpu.vector_store %arg5[%c0_6, %c0_7, %c0_8], %9 {strides = array<i32>} : memref<1x3x256xf32, #tpu.memory_space<vmem>>, vector<1x3x256xf32>,
    return
  }
  func.func @transform_0(%arg0: i32, %arg1: i32) -> (i32, i32) {
    %c0_i32 = arith.constant 0 : i32
    %c0_i32_0 = arith.constant 0 : i32
    %c0_i32_1 = arith.constant 0 : i32
    return %c0_i32, %c0_i32_0 : i32, i32
  }
  func.func @transform_1(%arg0: i32, %arg1: i32) -> (i32, i32) {
    %c0_i32 = arith.constant 0 : i32
    %c0_i32_0 = arith.constant 0 : i32
    %c0_i32_1 = arith.constant 0 : i32
    return %c0_i32, %c0_i32_0 : i32, i32
  }
  func.func @transform_2(%arg0: i32, %arg1: i32) -> (i32, i32, i32) {
    %c0_i32 = arith.constant 0 : i32
    %c0_i32_0 = arith.constant 0 : i32
    return %arg0, %c0_i32, %arg1 : i32, i32, i32
  }
  func.func @transform_3(%arg0: i32, %arg1: i32) -> (i32, i32, i32) {
    %c0_i32 = arith.constant 0 : i32
    %c0_i32_0 = arith.constant 0 : i32
    return %arg0, %c0_i32, %arg1 : i32, i32, i32
  }
}

</mosaic_0001>

<bundles_post_ra>
// kernel: outconv_1x1.1
= control target key start
LH: loop header
LB: loop body
LE: loop exit
PB: predicated region body
PF: predicated region fallthrough
CT: control target
= control target key end

     0   :  { %s452_s12 = smov 0   ;;  %s454_s13 = smov 0   ;;  %s494_s0 = inlined_call_operand.vmem [shape: f32[3,4], index: 0, kind: input, shape index: {}]   ;;  %s495_s1 = inlined_call_operand.vmem [shape: f32[3,1], index: 1, kind: input, shape index: {}]   ;;  %s496_s2 = inlined_call_operand.vmem [shape: f32[2,4,256], index: 2, kind: input, shape index: {}]   ;;  %s497_s3 = inlined_call_operand.vmem [shape: f32[2,3,256], index: 3, kind: output, shape index: {}]  }
   0x1   :  { %s456_s14 = smov 0  }
   0x2 LB: > { %s25_s15 = sadd.s32 1, %s425_s13  ;;  %p368_p0 = scmp.ge.s32.totalorder %s429_s14, 1  ;;  %s429_s14 = sphi %s456_s14, %s13_s14   ;;  %s425_s13 = sphi %s454_s13, %s499_s13   ;;  %s421_s12 = sphi %s452_s12, %s498_s12  }
   0x3   : > { %p27_p1 = scmp.ge.s32.totalorder %s25_s15, 2  ;;  %p158_p2 = scmp.lt.s32.totalorder %s429_s14, 3 }
   0x5   : > { %s501_s15 = smov (%p27_p1, %s25_s15), 0  ;;  %p159_p3 = pnand %p368_p0, %p158_p2 }
   0x6   : > { %p191_p4 = scmp.lt.s32.totalorder (!%p159_p3), %s421_s12, 1 }
   0x7   : > { %162 = sbr.rel (%p159_p3) target bundleno = 157 (0x9d), region = 32 }
   0xc   : > { %v431_v0 = vmov 0   ;;  %v212_v1 = vld [vmem:[%s495_s1] sm:$0x7]  ;;  %s503_s12 = smov (!%p191_p4, %s421_s12), 1  ;;  %vm226_vm0 = vcmask 1043456   ;;  %vm222_vm1 = vcmask 31744  }
   0xd   : > { %406 = vset.pattern.permute.xlu0 %v431_v0  ;;  %s379_s18 = sshll.u32 %s503_s12, 3  ;;  %v210_v3 = vld [vmem:[%s494_s0] sm:$0x7] }
   0xe   : > { %215 = vperm.xlu0 %406, %v212_v1   ;;  %s198_s21 = scalar_lea.vmem %s496_s2, %s379_s18  ;;  %s208_s26 = scalar_lea.vmem %s497_s3, %s379_s18 }
   0xf   : > { %v211_v2 = vld [vmem:[%s198_s21] sm:$0xff] }
  0x10   : > { %219 = vst [vmem:[#allocation1] ss:$2 sm:$0xff] %v211_v2 }
  0x17   : > { %v220_v4 = vld.sshfl [vmem:[#allocation1] sm:$0xff pattern:$0x75316420]  ;;  %v221_v5 = vld.sshfl [vmem:[#allocation1 + $0x8] sm:$0xff pattern:$0x75316420] }
  0x18   : > { %373 = vmatpush.msk.msra.mxu0 %vm226_vm0, %v220_v4  ;;  %375 = vmatpush.msk.msra.mxu1 %vm226_vm0, %v221_v5 }
  0x19   : > { %374 = vmatmul.msk.f32.vlgmr.msra.gmra.mxu0 %vm222_vm1, %v210_v3  ;;  %376 = vmatmul.msk.f32.vlgmr.msra.gmra.mxu1 %vm222_vm1, %v210_v3 }
  0x80   : > { %v216_v6 = vpop.permute.xlu0 %215 }
  0x96   : > { %v248_v7 = vpop.f32.mrf.mxu0  ;;  %v268_v8 = vpop.f32.mrf.mxu1 }
  0x97   : > { %v269_v9 = vadd.f32 %v268_v8, %v216_v6  ;;  %v249_v10 = vadd.f32 %v248_v7, %v216_v6 }
  0x99   : > { %v273_v11 = vrot.slane %v269_v9, 4 }
  0x9b   : > { %v274_v12 = vsel %vm226_vm0, %v249_v10, %v273_v11 }
  0x9c   : > { %276 = vst [vmem:[%s208_s26] sm:$0x77] %v274_v12 }
  0x9d PF: > { %s13_s14 = sadd.s32 1, %s429_s14   ;;  %s498_s12 = smov %s425_s13 }
  0x9e   : > { %p10_p5 = scmp.ge.s32.totalorder %s13_s14, 4   ;;  %s499_s13 = smov %s501_s15 }
  0xa0   :  { %12 = sbr.rel (!%p10_p5) target bundleno = 2 (0x2), region = 62 }

</bundles_post_ra>
